<compile_context>
chip_gen: v5e
topology: v5e:2x2
jax: 0.10.0
libtpu: 0.0.40
codegen_flags: <defaults>
</compile_context>

<pallas_src>
import functools
import math

import jax
import jax.numpy as jnp
from jax import lax
from jax.experimental import pallas as pl
from jax.experimental.pallas import tpu as pltpu


# --------------------------------------------------------------------------------------
# Kernel
# --------------------------------------------------------------------------------------
def _multilinear_kernel(*refs, has_scale, has_bias, compute_dtype):
    """refs: x (TT,B,C), w (TT,D,C)[, scale (TT,1,D)][, bias (TT,1,D)], out (TT,B,D)."""
    x_ref, w_ref = refs[0], refs[1]
    pos = 2
    s_ref = None
    b_ref = None
    if has_scale:
        s_ref = refs[pos]
        pos += 1
    if has_bias:
        b_ref = refs[pos]
        pos += 1
    o_ref = refs[pos]

    x = x_ref[...]
    if x.dtype != compute_dtype:
        x = x.astype(compute_dtype)                     # f32 act + narrow weights -> bf16 MXU
    w = w_ref[...]
    if w.dtype != compute_dtype:
        # Dequant/upcast on the VPU (int8/fp8/bf16 values are exact in bf16).
        w = w.astype(jnp.float32).astype(compute_dtype)

    # Single batched MXU pass: batch dim = TT positions, contract C (last dim of both
    # operands, the MXU-native "transposed rhs" form) -> (TT, B, D) f32 accumulator.
    acc = lax.dot_general(
        x, w,
        dimension_numbers=(((2,), (2,)), ((0,), (0,))),
        preferred_element_type=jnp.float32)

    if has_scale:
        acc = acc * s_ref[...].astype(jnp.float32)      # per-(t,d) dequant, broadcast over B
    if has_bias:
        acc = acc + b_ref[...].astype(jnp.float32)      # (TT,1,D) broadcast over B

    o_ref[...] = acc.astype(o_ref.dtype)


# --------------------------------------------------------------------------------------
# Generation-aware sizing helpers
# --------------------------------------------------------------------------------------
@functools.lru_cache(maxsize=1)
def _vmem_capacity_bytes():
    try:
        return int(pltpu.get_tpu_info().vmem_capacity_bytes)
    except Exception:
        return 64 << 20   # conservative fallback: v7x per-TensorCore VMEM


def _default_vmem_limit(capacity_bytes):
    # Leave headroom for compiler scratch: ~48 MiB on v7x (64 MiB VMEM), ~96 MiB on
    # v5e/v6e (128 MiB VMEM).
    return max(32 << 20, min((capacity_bytes * 3) // 4, capacity_bytes - (16 << 20)))


def _pick_block_t(T, per_t_bytes, vmem_budget_bytes, min_grid=4):
    """Largest divisor TT of T whose double-buffered footprint fits the budget while
    keeping at least `min_grid` grid steps (keeps both v7x TensorCores busy and leaves
    the DMA pipeline something to overlap)."""
    min_grid = max(1, min(min_grid, T))
    best = 1
    for d in range(1, T + 1):
        if T % d:
            continue
        if T // d < min_grid:
            break
        if 2 * d * per_t_bytes <= vmem_budget_bytes:
            best = d
    return best


# --------------------------------------------------------------------------------------
# Public wrapper
# --------------------------------------------------------------------------------------
@functools.partial(jax.jit,
                   static_argnames=("block_t", "seq_major_io", "vmem_limit_bytes"))
def multi_linear(x, weight, bias=None, weight_scale=None, *,
                 block_t=None, seq_major_io=False, vmem_limit_bytes=None):
    """MultiLinear forward.

    x:            (B, T, C) activations ((T, B, C) if seq_major_io=True)
    weight:       (T, D, C) per-position weights; float32 / bfloat16 / int8 / fp8_e4m3
    bias:         (T, D) or None
    weight_scale: (T, D) per-(t,d) dequant scales when weight is int8/fp8 (quantize_weight)
    returns:      (B, T, D) ((T, B, D) if seq_major_io=True), dtype of x
    """
    if seq_major_io:
        T, B, C = x.shape
    else:
        B, T, C = x.shape
    Tw, D, Cw = weight.shape
    assert Tw == T and Cw == C, "weight must be (T, D, C) matching x"
    has_bias = bias is not None
    has_scale = weight_scale is not None
    out_dtype = x.dtype

    # Pure bf16 x bf16 -> f32 whenever weights are streamed below f32 (well-defined
    # numerics, fewer MXU passes); plain f32 x f32 -> f32 otherwise.
    if weight.dtype == jnp.float32 and x.dtype == jnp.float32:
        compute_dtype = jnp.float32
    else:
        compute_dtype = jnp.bfloat16

    # TODO(synk): in a real model, produce/consume the seq-major (T, B, ...) layout
    # upstream (seq_major_io=True) so these boundary transposes (one extra HBM pass of
    # the activations each) disappear.
    x_sm = x if seq_major_io else jnp.transpose(x, (1, 0, 2))          # (T, B, C)

    # Generation-aware VMEM budget.
    vmem_cap = _vmem_capacity_bytes()
    if vmem_limit_bytes is None:
        vmem_limit_bytes = _default_vmem_limit(vmem_cap)
    vmem_limit_bytes = int(min(int(vmem_limit_bytes), vmem_cap))

    if block_t is None:
        per_t = (B * C * x.dtype.itemsize                 # x block
                 + D * C * weight.dtype.itemsize          # weight block (dominant)
                 + B * D * x.dtype.itemsize               # out block
                 + (D * bias.dtype.itemsize if has_bias else 0)
                 + (D * weight_scale.dtype.itemsize if has_scale else 0))
        block_t = _pick_block_t(T, per_t, int(vmem_limit_bytes * 0.8), min_grid=4)
    TT = int(block_t)
    assert T % TT == 0, "block_t must divide T"
    grid = (T // TT,)

    in_specs = [
        pl.BlockSpec((TT, B, C), lambda i: (i, 0, 0)),    # activations
        pl.BlockSpec((TT, D, C), lambda i: (i, 0, 0)),    # streamed weights
    ]
    operands = [x_sm, weight]
    if has_scale:
        in_specs.append(pl.BlockSpec((TT, 1, D), lambda i: (i, 0, 0)))
        operands.append(weight_scale.reshape(T, 1, D))
    if has_bias:
        in_specs.append(pl.BlockSpec((TT, 1, D), lambda i: (i, 0, 0)))
        operands.append(bias.reshape(T, 1, D))

    flops = 2 * B * T * C * D
    bytes_accessed = (T * B * C * x.dtype.itemsize
                      + T * D * C * weight.dtype.itemsize
                      + (T * D * weight_scale.dtype.itemsize if has_scale else 0)
                      + (T * D * bias.dtype.itemsize if has_bias else 0)
                      + T * B * D * x.dtype.itemsize)
    cost = pl.CostEstimate(flops=flops, transcendentals=0, bytes_accessed=bytes_accessed)

    kernel = functools.partial(_multilinear_kernel, has_scale=has_scale,
                               has_bias=has_bias, compute_dtype=compute_dtype)

    out_sm = pl.pallas_call(
        kernel,
        out_shape=jax.ShapeDtypeStruct((T, B, D), out_dtype),
        grid=grid,
        in_specs=in_specs,
        out_specs=pl.BlockSpec((TT, B, D), lambda i: (i, 0, 0)),
        compiler_params=pltpu.CompilerParams(
            dimension_semantics=("parallel",),
            vmem_limit_bytes=vmem_limit_bytes),
        cost_estimate=cost,
    )(*operands)

    return out_sm if seq_major_io else jnp.transpose(out_sm, (1, 0, 2))   # (B, T, D)


# --------------------------------------------------------------------------------------
# Weight quantization for low-bit streaming (pre-process once, outside the hot path)
# --------------------------------------------------------------------------------------
def quantize_weight(weight, fmt="int8"):
    """Per-(t, d) symmetric quantization of (T, D, C) weights.

    fmt="int8":     4x fewer weight HBM bytes than f32 — best on v5e/v6e.
    fmt="fp8_e4m3": for v7x, whose MXU has no integer datapath.
    Returns (q_weight, scale) with scale shaped (T, D).
    """
    w = weight.astype(jnp.float32)
    amax = jnp.max(jnp.abs(w), axis=-1, keepdims=True)                  # (T, D, 1)
    if fmt == "int8":
        qmax = 127.0
        scale = jnp.maximum(amax, 1e-12) / qmax
        q = jnp.clip(jnp.round(w / scale), -qmax, qmax).astype(jnp.int8)
    elif fmt in ("fp8_e4m3", "float8_e4m3fn"):
        qmax = 448.0
        scale = jnp.maximum(amax, 1e-12) / qmax
        q = (w / scale).astype(jnp.float8_e4m3fn)
    else:
        raise ValueError(f"unsupported quantization format: {fmt}")
    return q, scale[..., 0].astype(jnp.float32)


def init_multilinear_params(key, seq_length, in_features, out_features, dtype=jnp.float32):
    """Deterministic equivalent of MultiLinear.reset_parameters (uniform(-bound, bound))."""
    bound = 1.0 / math.sqrt(in_features)
    kw, kb = jax.random.split(key)
    weight = jax.random.uniform(
        kw, (seq_length, out_features, in_features), dtype=dtype,
        minval=-bound, maxval=bound)
    bias = jax.random.uniform(
        kb, (seq_length, out_features), dtype=dtype,
        minval=-bound, maxval=bound)
    return weight, bias


# --------------------------------------------------------------------------------------
# Self-test
# --------------------------------------------------------------------------------------
if __name__ == "__main__":
    # Small shapes consistent with the module: batch=2, seq=8, in_features=32, out_features=32.
    B, T, C, D = 2, 8, 32, 32

    key = jax.random.PRNGKey(0)
    kx, kp = jax.random.split(key)
    x = jax.random.normal(kx, (B, T, C), dtype=jnp.float32)
    weight, bias = init_multilinear_params(kp, T, C, D)

    ref_b = jnp.einsum("btc,tdc->btd", x, weight) + bias
    ref_nb = jnp.einsum("btc,tdc->btd", x, weight)

    # f32 path with bias.
    out = jax.block_until_ready(multi_linear(x, weight, bias))
    assert out.shape == (B, T, D)
    assert jnp.allclose(out, ref_b, atol=1e-5, rtol=1e-5), "mismatch vs reference (bias)"

    # no-bias path: bias is never allocated nor streamed.
    out_nb = jax.block_until_ready(multi_linear(x, weight))
    assert jnp.allclose(out_nb, ref_nb, atol=1e-5, rtol=1e-5), "mismatch vs reference (no bias)"

    # bf16 weight streaming: half the weight HBM bytes; pure bf16 x bf16 -> f32 MXU pass.
    out_bf16 = jax.block_until_ready(multi_linear(x, weight.astype(jnp.bfloat16), bias))
    assert jnp.allclose(out_bf16, ref_b, atol=5e-2, rtol=5e-2), "mismatch (bf16 weights)"

    # int8 weight streaming (v5e/v6e): 4x fewer weight HBM bytes, per-(t,d) dequant scales.
    wq, wscale = quantize_weight(weight, "int8")
    out_i8 = jax.block_until_ready(multi_linear(x, wq, bias, weight_scale=wscale))
    assert jnp.allclose(out_i8, ref_b, atol=5e-2, rtol=5e-2), "mismatch (int8 weights)"

    # seq-major I/O path: no boundary transposes at all.
    out_sm = jax.block_until_ready(
        multi_linear(jnp.transpose(x, (1, 0, 2)), weight, bias, seq_major_io=True))
    assert out_sm.shape == (T, B, D)
    assert jnp.allclose(jnp.transpose(out_sm, (1, 0, 2)), ref_b, atol=1e-5, rtol=1e-5), \
        "mismatch vs reference (seq-major io)"

    print("KERNEL_OK")
</pallas_src>

<mosaic_0001>
module attributes {stable_mosaic.version = 11 : i64} {
  func.func @_multilinear_kernel(%arg0: i32, %arg1: memref<2x2x32xf32, #tpu.memory_space<vmem>>, %arg2: memref<2x32x32xf32, #tpu.memory_space<vmem>>, %arg3: memref<2x1x32xf32, #tpu.memory_space<vmem>>, %arg4: memref<2x2x32xf32, #tpu.memory_space<vmem>>) attributes {dimension_semantics = [#tpu.dimension_semantics<parallel>], iteration_bounds = array<i64: 4>, scalar_prefetch = 0 : i64, scratch_operands = 0 : i64, tpu.core_type = #tpu.core_type<tc>, window_params = [{transform_indices = @transform_0, window_bounds = array<i64: 2, 2, 32>}, {transform_indices = @transform_1, window_bounds = array<i64: 2, 32, 32>}, {transform_indices = @transform_2, window_bounds = array<i64: 2, 1, 32>}, {transform_indices = @transform_3, window_bounds = array<i64: 2, 2, 32>}]} {
    %c0 = arith.constant 0 : index
    %c0_0 = arith.constant 0 : index
    %c0_1 = arith.constant 0 : index
    %0 = vector.load %arg1[%c0, %c0_0, %c0_1] : memref<2x2x32xf32, #tpu.memory_space<vmem>>, vector<2x2x32xf32>
    %c0_2 = arith.constant 0 : index
    %c0_3 = arith.constant 0 : index
    %c0_4 = arith.constant 0 : index
    %1 = vector.load %arg2[%c0_2, %c0_3, %c0_4] : memref<2x32x32xf32, #tpu.memory_space<vmem>>, vector<2x32x32xf32>
    %cst = arith.constant dense<0.000000e+00> : vector<2x2x32xf32>
    %2 = tpu.matmul %0, %1, %cst {dimension_numbers = #tpu.dot_dimension_numbers<[2], [2], [1], [1], [0, 0, 0, 1, 1, 1], [0], [0]>} : vector<2x2x32xf32>, vector<2x32x32xf32>, vector<2x2x32xf32> -> vector<2x2x32xf32>
    %c0_5 = arith.constant 0 : index
    %c0_6 = arith.constant 0 : index
    %c0_7 = arith.constant 0 : index
    %3 = vector.load %arg3[%c0_5, %c0_6, %c0_7] : memref<2x1x32xf32, #tpu.memory_space<vmem>>, vector<2x1x32xf32>
    %4 = vector.broadcast %3 : vector<2x1x32xf32> to vector<2x2x32xf32>
    %5 = arith.addf %2, %4 : vector<2x2x32xf32>
    %c0_8 = arith.constant 0 : index
    %c0_9 = arith.constant 0 : index
    %c0_10 = arith.constant 0 : index
    %6 = vector.load %arg4[%c0_8, %c0_9, %c0_10] : memref<2x2x32xf32, #tpu.memory_space<vmem>>, vector<2x2x32xf32>
    tpu.vector_store %arg4[%c0_8, %c0_9, %c0_10], %5 {strides = array<i32>} : memref<2x2x32xf32, #tpu.memory_space<vmem>>, vector<2x2x32xf32>,
    return
  }
  func.func @transform_0(%arg0: i32) -> (i32, i32, i32) {
    %c0_i32 = arith.constant 0 : i32
    %c0_i32_0 = arith.constant 0 : i32
    %c0_i32_1 = arith.constant 0 : i32
    return %arg0, %c0_i32, %c0_i32_0 : i32, i32, i32
  }
  func.func @transform_1(%arg0: i32) -> (i32, i32, i32) {
    %c0_i32 = arith.constant 0 : i32
    %c0_i32_0 = arith.constant 0 : i32
    %c0_i32_1 = arith.constant 0 : i32
    return %arg0, %c0_i32, %c0_i32_0 : i32, i32, i32
  }
  func.func @transform_2(%arg0: i32) -> (i32, i32, i32) {
    %c0_i32 = arith.constant 0 : i32
    %c0_i32_0 = arith.constant 0 : i32
    %c0_i32_1 = arith.constant 0 : i32
    return %arg0, %c0_i32, %c0_i32_0 : i32, i32, i32
  }
  func.func @transform_3(%arg0: i32) -> (i32, i32, i32) {
    %c0_i32 = arith.constant 0 : i32
    %c0_i32_0 = arith.constant 0 : i32
    %c0_i32_1 = arith.constant 0 : i32
    return %arg0, %c0_i32, %c0_i32_0 : i32, i32, i32
  }
}

</mosaic_0001>

<bundles_post_ra>
// kernel: multi_linear.1
= control target key start
LH: loop header
LB: loop body
LE: loop exit
PB: predicated region body
PF: predicated region fallthrough
CT: control target
= control target key end

     0   :  { %8 = vsyncpa [#allocation3], 0  ;;  %s684_s0 = inlined_call_operand.vmem [shape: f32[8,2,32], index: 0, kind: input, shape index: {}]   ;;  %s685_s1 = inlined_call_operand.hbm [shape: f32[8,32,32], index: 1, kind: input, shape index: {}]   ;;  %s686_s2 = inlined_call_operand.vmem [shape: f32[8,1,32], index: 2, kind: input, shape index: {}]   ;;  %s687_s3 = inlined_call_operand.vmem [shape: f32[8,2,32], index: 3, kind: output, shape index: {}]  }
   0x1   :  { %10 = vsyncpa [#allocation3 + $0x1], 0  ;;  %s577_s12 = smov 0   ;;  %s579_s13 = smov 0  }
   0x2   :  { %s581_s14 = smov 0   ;;  %s583_s15 = smov 0  }
   0x3 LB: > { %s417_s16 = sadd.s32 4294967295, %s553_s15   ;;  %s597_s17 = sadd.s32 1, %s553_s15   ;;  %s553_s15 = sphi %s583_s15, %s694_s15   ;;  %s549_s14 = sphi %s581_s14, %s693_s14   ;;  %s545_s13 = sphi %s579_s13, %s692_s13   ;;  %s541_s12 = sphi %s577_s12, %s691_s12  }
   0x4   : > { %s46_s18 = ssub.s32 %s553_s15, %s597_s17  ;;  %s49_s19 = sadd.s32 1, %s549_s14 }
   0x5   : > { %p47_p0 = scmp.eq.s32.totalorder %s46_s18, 0  ;;  %p56_p1 = scmp.ne.s32.totalorder %s549_s14, %s545_s13 }
   0x6   : > { %p57_p2 = scmp.eq.s32.totalorder %s553_s15, 0  ;;  %p62_p3 = scmp.ne.s32.totalorder %s545_s13, %s541_s12 }
   0x7   : > { %s607_s20 = scalar_select %p47_p0, %s549_s14, %s49_s19  }
   0x8   : > { %p609_p4 = por %p57_p2, %p56_p1  ;;  %p63_p5 = scmp.eq.s32.totalorder %s417_s16, 0 }
   0x9   : > { %p452_p6 = scmp.lt.s32.totalorder %s553_s15, 4  ;;  %s147_s23 = sand.u32 1, %s549_s14  }
   0xa   : > { %p616_p7 = por %p63_p5, %p62_p3  ;;  %s421_s24 = sshll.u32 %s147_s23, 6 }
   0xb   : > { %s445_s25 = sshll.u32 %s553_s15, 6  ;;  %s151_s29 = scalar_lea.vmem [#allocation2], %s421_s24 }
   0xc   : > { %s157_s28 = scalar_lea.hbm %s685_s1, %s445_s25  ;;  %s160_s30 = sshll.u32 %s151_s29, 4  ;;  %s161_s30 = int_to_ptr.vmem [resolvable:$true] %s160_s30 }
   0xd   : > { %s158_s4 = sshll.u32 %s157_s28, 4  ;;  %p627_p8 = pnand %p452_p6, %p609_p4  ;;  %s159_s4 = int_to_ptr.hbm [resolvable:$true] %s158_s4 }
   0xe   : > { %p425_p9 = scmp.ge.s32.totalorder %s553_s15, 1  ;;  %s148_s6 = scalar_lea.sflag [#allocation3], %s147_s23 }
   0xf   : > { %s489_s7 = sshra.s32 %s159_s4, 4  ;;  %p493_p11 = pneg %p627_p8  ;;  %s490_s7 = int_to_ptr.hbm [resolvable:$true] %s489_s7 }
  0x10   : > { %s491_s8 = scalar_lea.hbm %s490_s7, 64  ;;  %s496_s11 = scalar_lea.hbm %s685_s1, 256 }
  0x11   : > { %p492_p10 = scmp.ne.s32.totalorder %s490_s7, %s491_s8  ;;  %p497_p0 = scmp.lt.s32.totalorder %s490_s7, %s685_s1 }
  0x12   : > { %p498_p1 = scmp.lt.s32.totalorder %s496_s11, %s491_s8 }
  0x13   : > { %p494_p12 = pnand %p493_p11, %p492_p10 }
  0x14   : > { %p499_p2 = por %p498_p1, %p497_p0 }
  0x15   : > { %p495_p13 = pneg %p494_p12 }
  0x17   : > { %p500_p3 = pnand %p499_p2, %p495_p13 }
  0x19   : > { %503 = shalt.err (!%p500_p3)
}
  0x1a   : > { %s555_s19 = smov 128   ;;  %s556_s21 = smov 8  }
  0x1b   : > { %451 = dma.hbm_to_vmem [thread:$0]  (!%p627_p8), %s159_s4, 1024, %s161_s30, %s148_s6, %s555_s19, %s555_s19, %s556_s21  }
  0x1c   : > { %p176_p4 = scmp.lt.s32.totalorder %s553_s15, 5 }
  0x1e   : > { %p177_p5 = pnand %p425_p9, %p176_p4 }
  0x1f   : > { %s182_s23 = sand.u32 (!%p177_p5), 1, %s545_s13  }
  0x20   : > { %180 = sbr.rel (%p177_p5) target bundleno = 184 (0xb8), region = 32  ;;  %s426_s24 = sshll.u32 (!%p177_p5), %s182_s23, 6 }
  0x21   : > { %s183_s25 = scalar_lea.sflag (!%p177_p5), [#allocation3], %s182_s23  ;;  %s186_s26 = scalar_lea.vmem (!%p177_p5), [#allocation2], %s426_s24 }
  0x25   : > { %536 = dma.done.wait (%p616_p7), %s183_s25, 1024  }
  0x26   : > { %538 = vsyncadd (%p616_p7), %s183_s25, 4294966272  ;;  %s427_s27 = sshll.u32 %s417_s16, 1  ;;  %vm255_vm0 = vcmask 261120   ;;  %v242_v0 = vld [vmem:[%s186_s26 + $0x18] sm:$0xff]  ;;  %v241_v2 = vld [vmem:[%s186_s26 + $0x10] sm:$0xff]  ;;  %vm326_vm1 = vcmask 254976  }
  0x27   : > { %p220_p6 = scmp.lt.s32.totalorder %s427_s27, 7  ;;  %v246_v1 = vld [vmem:[%s186_s26 + $0x38] sm:$0xff]  ;;  %432 = vmatpush.xpose.msk.msra.mxu0 %vm255_vm0, %v242_v0  ;;  %v245_v3 = vld [vmem:[%s186_s26 + $0x30] sm:$0xff]  ;;  %v240_v4 = vld [vmem:[%s186_s26 + $0x8] sm:$0xff] }
  0x28   : > { %437 = vmatpush.xpose.msk.msra.mxu1 %vm255_vm0, %v246_v1  ;;  %v244_v5 = vld [vmem:[%s186_s26 + $0x28] sm:$0xff]  ;;  %v239_v6 = vld [vmem:[%s186_s26] sm:$0xff] }
  0x29   : > { %s696_s27 = smov (!%p220_p6, %s427_s27), 7  ;;  %v243_v7 = vld [vmem:[%s186_s26 + $0x20] sm:$0xff] }
  0x2a   : > { %s229_s30 = scalar_lea.vmem %s686_s2, %s696_s27  ;;  %s428_s15 = sshll.u32 %s696_s27, 1 }
  0x2b   : > { %433 = vmatpush.xpose.msk.msra.mxu0 %vm255_vm0, %v241_v2  ;;  %s223_s4 = scalar_lea.vmem %s684_s0, %s428_s15  ;;  %v487_v10 = vld [vmem:[%s229_s30] ss:$0 sm:$0xff]  ;;  %v488_v11 = vld [vmem:[%s229_s30 + $0x1] ss:$0 sm:$0xff]  ;;  %s235_s7 = scalar_lea.vmem %s687_s3, %s428_s15 }
  0x2c   : > { %438 = vmatpush.xpose.msk.msra.mxu1 %vm255_vm0, %v245_v3  ;;  %v237_v8 = vld [vmem:[%s223_s4] sm:$0x3]  ;;  %v238_v9 = vld [vmem:[%s223_s4 + $0x2] sm:$0x3] }
  0x2f   : > { %434 = vmatpush.xpose.msk.msra.mxu0 %vm255_vm0, %v240_v4 }
  0x30   : > { %439 = vmatpush.xpose.msk.msra.mxu1 %vm255_vm0, %v244_v5 }
  0x33   : > { %435 = vmatpush.xpose.msk.msra.mxu0 %vm255_vm0, %v239_v6 }
  0x34   : > { %440 = vmatpush.xpose.msk.msra.mxu1 %vm255_vm0, %v243_v7 }
  0x36   : > { %436 = vmatmul.msk.f32.vlgmr.msra.gmra.mxu0 %vm255_vm0, %v237_v8 }
  0x37   : > { %441 = vmatmul.msk.f32.vlgmr.msra.gmra.mxu1 %vm255_vm0, %v238_v9 }
  0xb3   : > { %v288_v12 = vpop.f32.mrf.mxu0 }
  0xb4   : > { %v323_v13 = vpop.f32.mrf.mxu1  ;;  %v289_v14 = vadd.f32 %v487_v10, %v288_v12 }
  0xb5   : > { %v324_v15 = vadd.f32 %v488_v11, %v323_v13 }
  0xb6   : > { %327 = vst.msk [vmem:[%s235_s7] sm:$0x3] %vm326_vm1, %v289_v14 }
  0xb7   : > { %328 = vst.msk [vmem:[%s235_s7 + $0x2] sm:$0x3] %vm326_vm1, %v324_v15 }
  0xb8 PF: > { %p13_p7 = scmp.ge.s32.totalorder %s597_s17, 6   ;;  %s691_s12 = smov %s545_s13 }
  0xb9   : > { %s692_s13 = smov %s549_s14  ;;  %s693_s14 = smov %s607_s20 }
  0xba   : > { %s694_s15 = smov %s597_s17  ;;  %15 = sbr.rel (!%p13_p7) target bundleno = 3 (0x3), region = 78 }
  0xbf   :  { %351 = vsyncpa [#allocation3], 1 }
  0xc0   :  { %353 = vsyncpa [#allocation3 + $0x1], 1 }

</bundles_post_ra>
